<compile_context>
chip_gen: v6e
topology: v6e:2x2x1
jax: 0.10.0
libtpu: 0.0.40
codegen_flags: <defaults>
</compile_context>

<pallas_src>
import jax
import jax.numpy as jnp
from jax.experimental import pallas as pl
from jax.experimental.pallas import tpu as pltpu


# ----------------------------------------------------------------------------
# Materialized-copy kernel: single HBM->HBM DMA, no grid, no VMEM staging.
# ----------------------------------------------------------------------------
def _hbm_copy_kernel(x_ref, o_ref):
    # Both refs live in HBM (memory_space=pl.ANY). One async DMA moves the
    # whole array; the TensorCore never touches the data, so there is no
    # per-step pipeline overhead, no vld/vst slot traffic, and no VMEM use.
    def body(sem):
        cp = pltpu.make_async_copy(x_ref, o_ref, sem)
        cp.start()
        cp.wait()

    pl.run_scoped(body, pltpu.SemaphoreType.DMA(()))


@jax.jit
def no_pool_copy_pallas(x):
    """Materialized identity: one direct HBM->HBM DMA into a distinct buffer."""
    return pl.pallas_call(
        _hbm_copy_kernel,
        out_shape=jax.ShapeDtypeStruct(x.shape, x.dtype),
        in_specs=[pl.BlockSpec(memory_space=pl.ANY)],
        out_specs=pl.BlockSpec(memory_space=pl.ANY),
    )(x)


# Below this size, kernel launch + DMA setup dominate; a fused XLA copy wins.
_SMALL_COPY_BYTES = 256 * 1024


def no_pool_forward(x, nInputNodes, nOutputNodes, nHops, *, materialize=False):
    """Pallas-backed NoPool.forward.

    Default path is a true identity (no kernel, no HBM traffic), matching the
    PyTorch semantics exactly. Set materialize=True only if a fresh buffer is
    required; that path runs the gridless HBM->HBM DMA kernel (or a plain XLA
    copy for tiny inputs).
    """
    # Same semantic checks as the PyTorch module (trace-time; shapes static).
    assert x.shape[2] == nInputNodes
    assert x.shape[2] >= nOutputNodes
    del nHops  # unused, kept for interface parity

    if not materialize:
        # Highest-value optimization: NoPool is an identity -> return x as-is.
        return x

    nbytes = x.size * jnp.dtype(x.dtype).itemsize
    if nbytes < _SMALL_COPY_BYTES:
        # Tiny input: plain XLA copy is strictly cheaper than a kernel launch.
        return jnp.copy(x)
    return no_pool_copy_pallas(x)


class NoPoolPallas:
    """Mirror of the PyTorch NoPool module (no parameters)."""

    def __init__(self, nInputNodes, nOutputNodes, nHops):
        self.nInputNodes = nInputNodes
        self.nOutputNodes = nOutputNodes
        self.nHops = nHops
        self.neighborhood = None

    def addGSO(self, GSO):
        pass  # NoPool ignores the GSO

    def __call__(self, x, *, materialize=False):
        return no_pool_forward(
            x, self.nInputNodes, self.nOutputNodes, self.nHops,
            materialize=materialize,
        )


if __name__ == "__main__":
    key = jax.random.PRNGKey(0)
    B, F, N = 2, 4, 16          # batch, features, nodes
    nInputNodes, nOutputNodes, nHops = N, N, 2

    x = jax.random.normal(key, (B, F, N), dtype=jnp.float32)

    layer = NoPoolPallas(nInputNodes, nOutputNodes, nHops)
    layer.addGSO(None)  # no-op, interface parity

    # Default (optimized) path: pure identity, no kernel launch, no HBM traffic.
    y_fast = layer(x)
    assert y_fast.shape == x.shape and y_fast.dtype == x.dtype
    assert bool(jnp.all(y_fast == x))

    # Wrapper materialize path: small input -> plain XLA copy threshold branch.
    y_small = jax.block_until_ready(layer(x, materialize=True))
    assert y_small.shape == x.shape and y_small.dtype == x.dtype
    assert bool(jnp.all(y_small == x))

    # Exercise the Pallas HBM->HBM DMA copy kernel directly (bypassing the
    # small-size threshold) so the kernel itself runs at least once on TPU.
    y = jax.block_until_ready(no_pool_copy_pallas(x))
    assert y.shape == x.shape
    assert y.dtype == x.dtype
    assert bool(jnp.all(y == x))

    print("KERNEL_OK")
</pallas_src>

<mosaic_0001>
module attributes {stable_mosaic.version = 11 : i64} {
  func.func @_hbm_copy_kernel(%arg0: memref<2x4x16xf32, #tpu.memory_space<any>>, %arg1: memref<2x4x16xf32, #tpu.memory_space<any>>) attributes {dimension_semantics = [], scalar_prefetch = 0 : i64, scratch_operands = 0 : i64, tpu.core_type = #tpu.core_type<tc>} {
    "tpu.region"() ({
      %0 = tpu.sem_alloc : memref<!tpu.dma_semaphore, #tpu.memory_space<semaphore_mem>>
      tpu.enqueue_dma source(%arg0 : memref<2x4x16xf32, #tpu.memory_space<any>>) target(%arg1 : memref<2x4x16xf32, #tpu.memory_space<any>>) target_semaphore(%0 : memref<!tpu.dma_semaphore, #tpu.memory_space<semaphore_mem>>)
      tpu.wait_dma2 semaphore(%0 : memref<!tpu.dma_semaphore, #tpu.memory_space<semaphore_mem>>) src(%arg0 : memref<2x4x16xf32, #tpu.memory_space<any>>) dst(%arg1 : memref<2x4x16xf32, #tpu.memory_space<any>>)
      tpu.yield
    }) : () -> ()
    return
  }
}

</mosaic_0001>

<bundles_post_ra>
// kernel: no_pool_copy_pallas.1
= control target key start
LH: loop header
LB: loop body
LE: loop exit
PB: predicated region body
PF: predicated region fallthrough
CT: control target
= control target key end

     0   :  { %s22_s6 = smov [#allocation2]   ;;  %s23_s7 = smov 131072   ;;  %s41_s0 = inlined_call_operand.hbm [shape: f32[2,4,16], index: 0, kind: input, shape index: {}]   ;;  %s42_s1 = inlined_call_operand.hbm [shape: f32[2,4,16], index: 1, kind: output, shape index: {}]  }
   0x1   :  { %s24_s8 = smov 0  }
   0x2   :  { %12 = dma.general %s41_s0, 128, %s42_s1, %s22_s6, %s23_s7, [#allocation4], %s24_s8, 0  }
   0x3   :  { %20 = dma.done.wait [#allocation2], 128 }
   0x4   :  { %21 = vsyncadd [#allocation2], 4294967168 }

</bundles_post_ra>
